<compile_context>
chip_gen: v6e
topology: v6e:2x2x1
jax: 0.10.0
libtpu: 0.0.40
codegen_flags: <defaults>
</compile_context>

<pallas_src>
import functools
import math

import jax
import jax.numpy as jnp
from jax import lax
from jax.experimental import pallas as pl
from jax.experimental.pallas import tpu as pltpu


def _round_up(x, m):
    return ((x + m - 1) // m) * m


def _transform_kernel(x_ref, wt_ref, b_ref, g_ref, beta_ref, o_ref, *,
                      eps, approximate_gelu):
    # x_ref: (tm, H) native dtype; wt_ref: (H_in, H_out) native dtype (already
    # transposed); b/g/beta: (1, H); o_ref: (tm, H).

    # Dense: x @ W.T + b.  Weight is pre-transposed in the wrapper, so this is
    # the MXU-native contraction with f32 accumulation -- no in-kernel
    # transpose/relayout of the (H, H) tile.
    y = jnp.dot(x_ref[...], wt_ref[...], preferred_element_type=jnp.float32)
    y = y + b_ref[...].astype(jnp.float32)

    if approximate_gelu:
        # tanh-approximate GELU: transcendental runs on the EUP slot (free
        # while VALU/MXU are busy).  Numerics differ slightly from exact GELU.
        c = math.sqrt(2.0 / math.pi)
        y = 0.5 * y * (1.0 + jnp.tanh(c * (y + 0.044715 * y * y * y)))
    else:
        # Exact erf GELU (matches torch.nn.functional.gelu / HF ACT2FN["gelu"]).
        y = 0.5 * y * (1.0 + lax.erf(y * (1.0 / math.sqrt(2.0))))

    # LayerNorm over the hidden dim -- two-pass (centered) variance in f32 for
    # precision parity with the PyTorch reference.
    mean = jnp.mean(y, axis=-1, keepdims=True)
    yc = y - mean
    var = jnp.mean(yc * yc, axis=-1, keepdims=True)
    y = yc * lax.rsqrt(var + eps)
    y = y * g_ref[...].astype(jnp.float32) + beta_ref[...].astype(jnp.float32)

    o_ref[...] = y.astype(o_ref.dtype)


def bert_prediction_head_transform(hidden_states, weight, bias, ln_gamma, ln_beta,
                                   *, eps=1e-12, tile_m=512,
                                   approximate_gelu=False, mxu_dtype=None):
    """hidden_states: (..., H); weight: (H_out, H_in) as in nn.Linear.

    Returns an array with the same shape/dtype as hidden_states.
    """
    orig_shape = hidden_states.shape
    H = orig_shape[-1]
    x2d = hidden_states.reshape(-1, H)
    M = x2d.shape[0]
    out_dtype = hidden_states.dtype

    # Pre-transpose the weight ONCE (HBM copy) so the kernel contracts
    # (tm, K) @ (K, N) in the MXU-native orientation.
    w_t = weight.T

    # Optional: cast MXU operands (e.g. to bf16 on v5e) while keeping the f32
    # accumulate/epilogue and the original output dtype.
    if mxu_dtype is not None:
        x2d = x2d.astype(mxu_dtype)
        w_t = w_t.astype(mxu_dtype)

    # Row-tile selection:
    #   * sublane granularity: 16 rows for bf16 (packed), 8 for 32-bit dtypes,
    #   * never (much) larger than the rounded row count,
    #   * split into >= 2 grid steps when possible (v7x megacore + pipelining).
    sublane = 16 if x2d.dtype == jnp.bfloat16 else 8
    m_rounded = _round_up(M, sublane)
    tm = max(sublane, min(_round_up(tile_m, sublane), m_rounded))
    if tm >= m_rounded and m_rounded >= 2 * sublane:
        tm = _round_up(pl.cdiv(m_rounded, 2), sublane)
    grid_m = pl.cdiv(M, tm)   # ragged last block handled by Pallas (no pad)

    b2d = bias.reshape(1, H)
    g2d = ln_gamma.reshape(1, H)
    beta2d = ln_beta.reshape(1, H)

    # Constant-index operands: fetched once, single-buffered in VMEM.
    const_buf = pl.Buffered(1)

    x_bytes = x2d.dtype.itemsize
    w_bytes = w_t.dtype.itemsize
    o_bytes = jnp.dtype(out_dtype).itemsize
    vmem_need = (2 * tm * H * x_bytes          # x tile, double-buffered
                 + 2 * tm * H * o_bytes        # out tile, double-buffered
                 + H * H * w_bytes             # weight, single-buffered
                 + 3 * _round_up(H, 128) * 4   # bias / gamma / beta
                 + 2 * tm * H * 4)             # f32 epilogue headroom
    # Cap at 48 MiB so the limit stays safely inside v7x's 64 MiB/TC VMEM.
    vmem_limit = int(min(48 * 2**20, max(16 * 2**20, int(1.5 * vmem_need))))

    cost = pl.CostEstimate(
        flops=2 * M * H * H,
        transcendentals=M * H,
        bytes_accessed=(M * H * x_bytes + H * H * w_bytes
                        + M * H * o_bytes + 3 * H * 4),
    )

    out = pl.pallas_call(
        functools.partial(_transform_kernel, eps=eps,
                          approximate_gelu=approximate_gelu),
        out_shape=jax.ShapeDtypeStruct((M, H), out_dtype),
        grid_spec=pltpu.PrefetchScalarGridSpec(
            num_scalar_prefetch=0,
            grid=(grid_m,),
            in_specs=[
                pl.BlockSpec((tm, H), lambda i: (i, 0)),                           # x tile
                pl.BlockSpec((H, H), lambda i: (0, 0), pipeline_mode=const_buf),   # W.T (in, out)
                pl.BlockSpec((1, H), lambda i: (0, 0), pipeline_mode=const_buf),   # bias
                pl.BlockSpec((1, H), lambda i: (0, 0), pipeline_mode=const_buf),   # LN gamma
                pl.BlockSpec((1, H), lambda i: (0, 0), pipeline_mode=const_buf),   # LN beta
            ],
            out_specs=pl.BlockSpec((tm, H), lambda i: (i, 0)),
        ),
        compiler_params=pltpu.CompilerParams(
            dimension_semantics=("parallel",),
            vmem_limit_bytes=vmem_limit),
        cost_estimate=cost,
    )(x2d, w_t, b2d, g2d, beta2d)

    return out.reshape(orig_shape)


def _reference(x, weight, bias, gamma, beta, eps=1e-12):
    y = x @ weight.T + bias
    y = 0.5 * y * (1.0 + lax.erf(y / jnp.sqrt(2.0)))
    mean = jnp.mean(y, axis=-1, keepdims=True)
    var = jnp.mean((y - mean) ** 2, axis=-1, keepdims=True)
    y = (y - mean) / jnp.sqrt(var + eps)
    return y * gamma + beta


if __name__ == "__main__":
    # Small BERT-like config: batch=2, seq=8, hidden=32.
    B, S, H = 2, 8, 32
    key = jax.random.PRNGKey(0)
    k_x, k_w, k_b, k_g, k_beta = jax.random.split(key, 5)

    hidden_states = jax.random.normal(k_x, (B, S, H), dtype=jnp.float32)
    # Deterministic synthetic params (shapes from nn.Linear(H,H) / nn.LayerNorm(H)).
    weight = jax.random.normal(k_w, (H, H), dtype=jnp.float32) * 0.02   # (out, in)
    bias = jax.random.normal(k_b, (H,), dtype=jnp.float32) * 0.02
    ln_gamma = jnp.ones((H,), dtype=jnp.float32) + 0.1 * jax.random.normal(k_g, (H,))
    ln_beta = 0.1 * jax.random.normal(k_beta, (H,), dtype=jnp.float32)

    out = bert_prediction_head_transform(hidden_states, weight, bias, ln_gamma, ln_beta)
    out = jax.block_until_ready(out)
    ref = _reference(hidden_states, weight, bias, ln_gamma, ln_beta)
    assert out.shape == hidden_states.shape
    assert jnp.allclose(out, ref, atol=1e-5, rtol=1e-5), "mismatch vs reference"

    # Ragged row count (M = 15, not a multiple of the 8-row tile): exercises the
    # no-pad partial-last-block path.
    hs2 = jax.random.normal(jax.random.PRNGKey(1), (3, 5, H), dtype=jnp.float32)
    out2 = jax.block_until_ready(
        bert_prediction_head_transform(hs2, weight, bias, ln_gamma, ln_beta))
    ref2 = _reference(hs2, weight, bias, ln_gamma, ln_beta)
    assert out2.shape == hs2.shape
    assert jnp.allclose(out2, ref2, atol=1e-5, rtol=1e-5), "ragged-M mismatch"

    print("KERNEL_OK")
</pallas_src>

<mosaic_0001>
module attributes {stable_mosaic.version = 11 : i64} {
  func.func @_transform_kernel(%arg0: i32, %arg1: memref<8x32xf32, #tpu.memory_space<vmem>>, %arg2: memref<32x32xf32, #tpu.memory_space<vmem>>, %arg3: memref<1x32xf32, #tpu.memory_space<vmem>>, %arg4: memref<1x32xf32, #tpu.memory_space<vmem>>, %arg5: memref<1x32xf32, #tpu.memory_space<vmem>>, %arg6: memref<8x32xf32, #tpu.memory_space<vmem>>) attributes {dimension_semantics = [#tpu.dimension_semantics<parallel>], iteration_bounds = array<i64: 2>, scalar_prefetch = 0 : i64, scratch_operands = 0 : i64, tpu.core_type = #tpu.core_type<tc>, window_params = [{transform_indices = @transform_0, window_bounds = array<i64: 8, 32>}, {pipeline_mode = #tpu.pipeline_mode<synchronous>, transform_indices = @transform_1, window_bounds = array<i64: 32, 32>}, {pipeline_mode = #tpu.pipeline_mode<synchronous>, transform_indices = @transform_2, window_bounds = array<i64: 1, 32>}, {pipeline_mode = #tpu.pipeline_mode<synchronous>, transform_indices = @transform_3, window_bounds = array<i64: 1, 32>}, {pipeline_mode = #tpu.pipeline_mode<synchronous>, transform_indices = @transform_4, window_bounds = array<i64: 1, 32>}, {transform_indices = @transform_5, window_bounds = array<i64: 8, 32>}]} {
    %c0 = arith.constant 0 : index
    %c0_0 = arith.constant 0 : index
    %0 = vector.load %arg1[%c0, %c0_0] : memref<8x32xf32, #tpu.memory_space<vmem>>, vector<8x32xf32>
    %c0_1 = arith.constant 0 : index
    %c0_2 = arith.constant 0 : index
    %1 = vector.load %arg2[%c0_1, %c0_2] : memref<32x32xf32, #tpu.memory_space<vmem>>, vector<32x32xf32>
    %cst = arith.constant dense<0.000000e+00> : vector<8x32xf32>
    %2 = tpu.matmul %0, %1, %cst {dimension_numbers = #tpu.dot_dimension_numbers<[1], [0], [0], [1], [0, 0, 1, 1], [], []>} : vector<8x32xf32>, vector<32x32xf32>, vector<8x32xf32> -> vector<8x32xf32>
    %c0_3 = arith.constant 0 : index
    %c0_4 = arith.constant 0 : index
    %3 = vector.load %arg3[%c0_3, %c0_4] : memref<1x32xf32, #tpu.memory_space<vmem>>, vector<1x32xf32>
    %4 = vector.broadcast %3 : vector<1x32xf32> to vector<8x32xf32>
    %5 = arith.addf %2, %4 : vector<8x32xf32>
    %cst_5 = arith.constant 5.000000e-01 : f32
    %6 = vector.broadcast %cst_5 : f32 to vector<8x32xf32>
    %7 = arith.mulf %6, %5 : vector<8x32xf32>
    %cst_6 = arith.constant 0.707106769 : f32
    %8 = vector.broadcast %cst_6 : f32 to vector<8x32xf32>
    %9 = arith.mulf %5, %8 : vector<8x32xf32>
    %10 = math.erf %9 : vector<8x32xf32>
    %cst_7 = arith.constant 1.000000e+00 : f32
    %11 = vector.broadcast %cst_7 : f32 to vector<8x32xf32>
    %12 = arith.addf %11, %10 : vector<8x32xf32>
    %13 = arith.mulf %7, %12 : vector<8x32xf32>
    %cst_8 = arith.constant dense<0.000000e+00> : vector<8xf32>
    %14 = vector.multi_reduction <add>, %13, %cst_8 [1] : vector<8x32xf32> to vector<8xf32>
    %15 = vector.shape_cast %14 : vector<8xf32> to vector<8x1xf32>
    %cst_9 = arith.constant 3.200000e+01 : f32
    %16 = vector.broadcast %cst_9 : f32 to vector<8x1xf32>
    %17 = arith.divf %15, %16 : vector<8x1xf32>
    %18 = vector.broadcast %17 : vector<8x1xf32> to vector<8x32xf32>
    %19 = arith.subf %13, %18 : vector<8x32xf32>
    %20 = arith.mulf %19, %19 : vector<8x32xf32>
    %cst_10 = arith.constant dense<0.000000e+00> : vector<8xf32>
    %21 = vector.multi_reduction <add>, %20, %cst_10 [1] : vector<8x32xf32> to vector<8xf32>
    %22 = vector.shape_cast %21 : vector<8xf32> to vector<8x1xf32>
    %cst_11 = arith.constant 3.200000e+01 : f32
    %23 = vector.broadcast %cst_11 : f32 to vector<8x1xf32>
    %24 = arith.divf %22, %23 : vector<8x1xf32>
    %cst_12 = arith.constant 9.99999996E-13 : f32
    %25 = vector.broadcast %cst_12 : f32 to vector<8x1xf32>
    %26 = arith.addf %24, %25 : vector<8x1xf32>
    %27 = math.rsqrt %26 : vector<8x1xf32>
    %28 = vector.broadcast %27 : vector<8x1xf32> to vector<8x32xf32>
    %29 = arith.mulf %19, %28 : vector<8x32xf32>
    %c0_13 = arith.constant 0 : index
    %c0_14 = arith.constant 0 : index
    %30 = vector.load %arg4[%c0_13, %c0_14] : memref<1x32xf32, #tpu.memory_space<vmem>>, vector<1x32xf32>
    %31 = vector.broadcast %30 : vector<1x32xf32> to vector<8x32xf32>
    %32 = arith.mulf %29, %31 : vector<8x32xf32>
    %c0_15 = arith.constant 0 : index
    %c0_16 = arith.constant 0 : index
    %33 = vector.load %arg5[%c0_15, %c0_16] : memref<1x32xf32, #tpu.memory_space<vmem>>, vector<1x32xf32>
    %34 = vector.broadcast %33 : vector<1x32xf32> to vector<8x32xf32>
    %35 = arith.addf %32, %34 : vector<8x32xf32>
    %c0_17 = arith.constant 0 : index
    %c0_18 = arith.constant 0 : index
    %36 = vector.load %arg6[%c0_17, %c0_18] : memref<8x32xf32, #tpu.memory_space<vmem>>, vector<8x32xf32>
    tpu.vector_store %arg6[%c0_17, %c0_18], %35 {strides = array<i32>} : memref<8x32xf32, #tpu.memory_space<vmem>>, vector<8x32xf32>,
    return
  }
  func.func @transform_0(%arg0: i32) -> (i32, i32) {
    %c0_i32 = arith.constant 0 : i32
    %c0_i32_0 = arith.constant 0 : i32
    return %arg0, %c0_i32 : i32, i32
  }
  func.func @transform_1(%arg0: i32) -> (i32, i32) {
    %c0_i32 = arith.constant 0 : i32
    %c0_i32_0 = arith.constant 0 : i32
    %c0_i32_1 = arith.constant 0 : i32
    return %c0_i32, %c0_i32_0 : i32, i32
  }
  func.func @transform_2(%arg0: i32) -> (i32, i32) {
    %c0_i32 = arith.constant 0 : i32
    %c0_i32_0 = arith.constant 0 : i32
    %c0_i32_1 = arith.constant 0 : i32
    return %c0_i32, %c0_i32_0 : i32, i32
  }
  func.func @transform_3(%arg0: i32) -> (i32, i32) {
    %c0_i32 = arith.constant 0 : i32
    %c0_i32_0 = arith.constant 0 : i32
    %c0_i32_1 = arith.constant 0 : i32
    return %c0_i32, %c0_i32_0 : i32, i32
  }
  func.func @transform_4(%arg0: i32) -> (i32, i32) {
    %c0_i32 = arith.constant 0 : i32
    %c0_i32_0 = arith.constant 0 : i32
    %c0_i32_1 = arith.constant 0 : i32
    return %c0_i32, %c0_i32_0 : i32, i32
  }
  func.func @transform_5(%arg0: i32) -> (i32, i32) {
    %c0_i32 = arith.constant 0 : i32
    %c0_i32_0 = arith.constant 0 : i32
    return %arg0, %c0_i32 : i32, i32
  }
}

</mosaic_0001>

<bundles_post_ra>
// kernel: tpu_custom_call.1
= control target key start
LH: loop header
LB: loop body
LE: loop exit
PB: predicated region body
PF: predicated region fallthrough
CT: control target
= control target key end

     0   :  { %10 = vsyncpa [#allocation3], 0  ;;  %s902_s0 = inlined_call_operand.hbm [shape: f32[16,32], index: 0, kind: input, shape index: {}]   ;;  %s903_s1 = inlined_call_operand.hbm [shape: f32[32,32], index: 1, kind: input, shape index: {}]   ;;  %s904_s2 = inlined_call_operand.vmem [shape: f32[1,32], index: 2, kind: input, shape index: {}]   ;;  %s905_s3 = inlined_call_operand.vmem [shape: f32[1,32], index: 3, kind: input, shape index: {}]   ;;  %s906_s4 = inlined_call_operand.vmem [shape: f32[1,32], index: 4, kind: input, shape index: {}]   ;;  %s907_s5 = inlined_call_operand.hbm [shape: f32[16,32], index: 5, kind: output, shape index: {}]  }
   0x1   :  { %12 = vsyncpa [#allocation3 + $0x1], 0 }
   0x2   :  { %13 = vsyncpa [#allocation6], 0 }
   0x3   :  { %14 = vsyncpa [#allocation4], 0 }
   0x4   :  { %16 = vsyncpa [#allocation4 + $0x1], 0  ;;  %s731_s18 = smov 0   ;;  %s733_s19 = smov 0  }
   0x5   :  { %s735_s20 = smov 0   ;;  %s737_s21 = smov 0  }
   0x6 LB: > { %s752_s22 = sadd.s32 4294967295, %s692_s21   ;;  %s471_s23 = sadd.s32 4294967294, %s692_s21   ;;  %s692_s21 = sphi %s737_s21, %s929_s21   ;;  %s688_s20 = sphi %s735_s20, %s928_s20   ;;  %s684_s19 = sphi %s733_s19, %s927_s19   ;;  %s680_s18 = sphi %s731_s18, %s926_s18  }
   0x7   : > { %p42_p0 = scmp.ne.s32.totalorder %s684_s19, %s680_s18  ;;  %p908_p1 = scmp.eq.s32.totalorder %s752_s22, 0 }
   0x8   : > { %p156_p3 = scmp.eq.s32.totalorder %s471_s23, 1  ;;  %p472_p5 = scmp.ge.s32.totalorder %s692_s21, 1 }
   0x9   : > { %p761_p4 = por %p908_p1, %p42_p0  ;;  %p163_p7 = scmp.lt.s32.totalorder %s692_s21, 3 }
   0xa   : > { %p766_p6 = por %p156_p3, %p42_p0  ;;  %s694_s27 = smov [#allocation5]  }
   0xb   : > { %s912_s24 = scalar_select %p761_p4, 1, 0 }
   0xc   : > { %s913_s25 = scalar_select %p766_p6, 1, 0 }
   0xd   : > { %p771_p8 = pnand %p472_p5, %p163_p7  ;;  %s175_s28 = sshll.u32 %s694_s27, 4  ;;  %s176_s28 = int_to_ptr.vmem [resolvable:$true] %s175_s28 }
   0xe   : > { %s785_s30 = sadd.s32 1, %s692_s21   ;;  %s29_s6 = sadd.s32 1, %s688_s20 }
   0xf   : > { %s914_s26 = scalar_select %p771_p8, 1, 0 }
  0x10   : > { %p513_p9 = pneg %p771_p8  ;;  %s26_s7 = ssub.s32 %s692_s21, %s785_s30 }
  0x11   : > { %s581_s8 = scalar_lea.vmem %s176_s28, 512  ;;  %p589_p5 = scmp.lt.s32.totalorder %s176_s28, %s176_s28 }
  0x12   : > { %p780_p11 = pnand %p513_p9, %p908_p1  ;;  %p582_p13 = scmp.ne.s32.totalorder %s176_s28, %s581_s8 }
  0x13   : > { %p590_p7 = scmp.lt.s32.totalorder %s581_s8, %s581_s8 }
  0x14   : > { %p572_p12 = pneg %p780_p11 }
  0x15   : > { %p591_p10 = por %p590_p7, %p589_p5 }
  0x16   : > { %p584_p0 = pnand %p582_p13, %p572_p12 }
  0x18   : > { %p585_p3 = pneg %p584_p0 }
  0x1a   : > { %p592_p2 = pnand %p591_p10, %p585_p3 }
  0x1c   : > { %595 = shalt.err (!%p592_p2)
}
  0x1d   : > { %s695_s9 = smov 128   ;;  %s696_s10 = smov 8  }
  0x1e   : > { %516 = dma.hbm_to_vmem [thread:$0]  (!%p780_p11), %s903_s1, 512, %s176_s28, [#allocation6], %s695_s9, %s695_s9, %s696_s10  }
  0x1f   : > { %p27_p9 = scmp.eq.s32.totalorder %s26_s7, 0  ;;  %p36_p12 = scmp.ne.s32.totalorder %s688_s20, %s684_s19 }
  0x20   : > { %p37_p10 = scmp.eq.s32.totalorder %s692_s21, 0  ;;  %p526_p2 = scmp.lt.s32.totalorder %s692_s21, 2 }
  0x21   : > { %s802_s13 = scalar_select %p27_p9, %s688_s20, %s29_s6  }
  0x22   : > { %p38_p13 = por %p37_p10, %p36_p12  ;;  %p916_p0 = scmp.eq.s32.totalorder %s752_s22, 1 }
  0x23   : > { %s198_s15 = sand.u32 1, %s688_s20   ;;  %s476_s16 = sshll.u32 %s692_s21, 7 }
  0x24   : > { %p806_p3 = por %p916_p0, %p36_p12  ;;  %s475_s17 = sshll.u32 %s198_s15, 3 }
  0x25   : > { %s815_s29 = scalar_lea.hbm %s902_s0, %s476_s16  ;;  %s202_s28 = scalar_lea.vmem [#allocation2], %s475_s17 }
  0x26   : > { %s917_s14 = scalar_select %p806_p3, 1, 0 }
  0x27   : > { %s209_s6 = sshll.u32 %s202_s28, 4  ;;  %p817_p11 = pnand %p526_p2, %p38_p13  ;;  %s210_s6 = int_to_ptr.vmem [resolvable:$true] %s209_s6 }
  0x28   : > { %s199_s8 = scalar_lea.sflag [#allocation3], %s198_s15  ;;  %s596_s9 = scalar_lea.hbm %s815_s29, 128 }
  0x29   : > { %p597_p5 = scmp.ne.s32.totalorder %s815_s29, %s596_s9  ;;  %p598_p7 = pneg %p817_p11 }
  0x2a   : > { %s601_s12 = scalar_lea.hbm %s902_s0, 256  ;;  %p602_p10 = scmp.lt.s32.totalorder %s815_s29, %s902_s0 }
  0x2b   : > { %p599_p9 = pnand %p598_p7, %p597_p5  ;;  %p603_p2 = scmp.lt.s32.totalorder %s601_s12, %s596_s9 }
  0x2d   : > { %p600_p12 = pneg %p599_p9  ;;  %p604_p13 = por %p603_p2, %p602_p10 }
  0x2f   : > { %p605_p0 = pnand %p604_p13, %p600_p12 }
  0x31   : > { %608 = shalt.err (!%p605_p0)
}
  0x32   : > { %s609_s23 = scalar_lea.vmem %s210_s6, 128  ;;  %s697_s15 = smov [#allocation2]  }
  0x33   : > { %p610_p1 = scmp.ne.s32.totalorder %s210_s6, %s609_s23  ;;  %s614_s27 = sshll.u32 %s697_s15, 4  ;;  %s615_s27 = int_to_ptr.vmem [resolvable:$false] %s614_s27 }
  0x34   : > { %s616_s28 = scalar_lea.vmem %s615_s27, 256  ;;  %p617_p5 = scmp.lt.s32.totalorder %s210_s6, %s615_s27 }
  0x35   : > { %p612_p6 = pnand %p610_p1, %p598_p7  ;;  %p618_p9 = scmp.lt.s32.totalorder %s616_s28, %s609_s23 }
  0x37   : > { %p613_p3 = pneg %p612_p6  ;;  %p619_p4 = por %p618_p9, %p617_p5 }
  0x39   : > { %p620_p8 = pnand %p619_p4, %p613_p3 }
  0x3b   : > { %623 = shalt.err (!%p620_p8)
}
  0x3c   : > { %520 = dma.hbm_to_vmem [thread:$0]  (!%p817_p11), %s815_s29, 128, %s210_s6, %s199_s8  }
  0x3d   : > { %p919_p12 = scmp.ne.s32.totalorder %s914_s26, 0 }
  0x3e   : > { %s838_s9 = sand.u32 (!%p919_p12), 1, %s684_s19   ;;  %p920_p1 = scmp.ne.s32.totalorder (!%p919_p12), %s912_s24, 0 }
  0x3f   : > { %218 = sbr.rel (%p919_p12) target bundleno = 617 (0x269), region = 40  ;;  %s478_s10 = sshll.u32 (!%p919_p12), %s838_s9, 3 }
  0x40   : > { %s221_s11 = scalar_lea.sflag (!%p919_p12), [#allocation3], %s838_s9  ;;  %s224_s12 = scalar_lea.vmem (!%p919_p12), [#allocation2], %s478_s10 }
  0x44   : > { %667 = dma.done.wait (%p920_p1), %s221_s11, 128  }
  0x45   : > { %669 = vsyncadd (%p920_p1), %s221_s11, 4294967168  ;;  %p921_p4 = scmp.eq.s32.totalorder %s752_s22, 0 }
  0x47   : > { %671 = dma.done.wait (%p921_p4), [#allocation6], 512   ;;  %p922_p6 = pmov %p921_p4 }
  0x48   : > { %v698_v0 = vmov 0.0   ;;  %vm699_vm0 = vmmov 0   ;;  %v259_v1 = vld [vmem:[#allocation5 + $0x18] sm:$0xff]  ;;  %v258_v2 = vld [vmem:[#allocation5 + $0x10] sm:$0xff]  ;;  %v257_v3 = vld [vmem:[#allocation5 + $0x8] sm:$0xff]  ;;  %vm267_vm1 = vcmask 261120  }
  0x49   : > { %673 = vsyncadd (%p922_p6), [#allocation6], 4294966784  ;;  %494 = vmatprep.subr.mxu0 %v698_v0  ;;  %502 = vmatprep.mubr.msk.f32.mxu0 %vm699_vm0, %v698_v0  ;;  %v256_v4 = vld [vmem:[#allocation5] sm:$0xff]  ;;  %v255_v5 = vld [vmem:[%s224_s12] sm:$0xff]  ;;  %s486_s16 = sshll.u32 %s752_s22, 7  ;;  %s254_s17 = scalar_lea.vmem [#allocation7], %s478_s10 }
  0x4a   : > { %495 = vmatpush3.msra.mxu0 %v259_v1  ;;  %v481_v6 = vld [vmem:[%s904_s2] ss:$0 sm:$0xff]  ;;  %s391_s23 = sshll.u32 %s254_s17, 4  ;;  %s389_s28 = scalar_lea.hbm %s907_s5, %s486_s16  ;;  %s392_s23 = int_to_ptr.vmem [resolvable:$true] %s391_s23 }
  0x4b   : > { %496 = vmatprep.subr.mxu0 %v698_v0  ;;  %v483_v25 = vld [vmem:[%s905_s3] ss:$0 sm:$0xff]  ;;  %s378_s11 = scalar_lea.sflag [#allocation4], %s838_s9  ;;  %s624_s12 = scalar_lea.vmem %s392_s23, 128 }
  0x4c   : > { %497 = vmatpush3.msra.mxu0 %v258_v2  ;;  %v484_v27 = vld [vmem:[%s906_s4] ss:$0 sm:$0xff]  ;;  %p625_p8 = scmp.ne.s32.totalorder %s392_s23, %s624_s12  ;;  %p923_p3 = scmp.ne.s32.totalorder %s917_s14, 0 }
  0x4d   : > { %498 = vmatprep.subr.mxu0 %v698_v0  ;;  %s700_s24 = smov [#allocation7]  }
  0x4e   : > { %499 = vmatpush3.msra.mxu0 %v257_v3  ;;  %p626_p11 = pnand %p625_p8, %p923_p3  ;;  %s628_s22 = sshll.u32 %s700_s24, 4  ;;  %s629_s22 = int_to_ptr.vmem [resolvable:$false] %s628_s22 }
  0x4f   : > { %500 = vmatprep.subr.mxu0 %v698_v0  ;;  %s630_s10 = scalar_lea.vmem %s629_s22, 256  ;;  %p631_p10 = scmp.lt.s32.totalorder %s392_s23, %s629_s22 }
  0x50   : > { %501 = vmatpush3.msra.mxu0 %v256_v4  ;;  %p627_p7 = pneg %p626_p11  ;;  %p632_p2 = scmp.lt.s32.totalorder %s630_s10, %s624_s12 }
  0x51   : > { %503 = vmatmul.mubr.msk.f32.vlgmr.msra.gmra.mxu0 %vm267_vm1, %v255_v5 }
  0x52   : > { %p633_p13 = por %p632_p2, %p631_p10 }
  0x54   : > { %p634_p0 = pnand %p633_p13, %p627_p7 }
 0x111   : > { %v337_v7 = vpop.f32.mrf.mxu0 }
 0x112   : > { %v338_v8 = vadd.f32 %v481_v6, %v337_v7 }
 0x113   : > { %v504_v9 = vpop.f32.mrf.mxu0 }
 0x114   : > { %v342_v10 = vmul.f32 0.70710677, %v338_v8  ;;  %v341_v12 = vmul.f32 0.5, %v338_v8 }
 0x116   : > { %566 = verf.f32 %v342_v10 }
 0x123   : > { %v567_v11 = vpop.eup %566 }
 0x124   : > { %v344_v13 = vadd.f32 1.0, %v567_v11 }
 0x126   : > { %v345_v14 = vmul.f32 %v344_v13, %v341_v12 }
 0x128   : > { %v346_v15 = vsel %vm267_vm1, %v345_v14, 0.0 }
 0x129   : > { %347 = vadd.xlane.f32.xlu0 %v346_v15 }
 0x1b2   : > { %v348_v16 = vpop.xlane.xlu0 %347 }
 0x1b3   : > { %v350_v17 = vmul.f32 0.03125, %v348_v16 }
 0x1b5   : > { %v351_v18 = vsub.f32 %v345_v14, %v350_v17 }
 0x1b7   : > { %v352_v19 = vmul.f32 %v351_v18, %v351_v18 }
 0x1b9   : > { %v353_v20 = vsel %vm267_vm1, %v352_v19, 0.0 }
 0x1ba   : > { %354 = vadd.xlane.f32.xlu0 %v353_v20 }
 0x243   : > { %v355_v21 = vpop.xlane.xlu0 %354 }
 0x244   : > { %v356_v22 = vmul.f32 0.03125, %v355_v21 }
 0x246   : > { %v357_v23 = vadd.f32 1e-12, %v356_v22 }
 0x248   : > { %568 = vrsqrt.f32 %v357_v23 }
 0x255   : > { %v569_v24 = vpop.eup %568 }
 0x256   : > { %v359_v26 = vmul.f32 %v569_v24, %v351_v18 }
 0x258   : > { %v367_v28 = vmul.f32 %v483_v25, %v359_v26 }
 0x25a   : > { %v375_v29 = vadd.f32 %v484_v27, %v367_v28 }
 0x25c   : > { %376 = vst.msk [vmem:[%s254_s17] sm:$0xff] %vm267_vm1, %v375_v29 }
 0x25d   : > { %637 = shalt.err (!%p634_p0)
}
 0x25e   : > { %s638_s26 = scalar_lea.hbm %s389_s28, 128  ;;  %s642_s6 = scalar_lea.hbm %s907_s5, 256 }
 0x25f   : > { %p639_p5 = scmp.ne.s32.totalorder %s389_s28, %s638_s26  ;;  %p643_p1 = scmp.lt.s32.totalorder %s389_s28, %s907_s5 }
 0x260   : > { %p644_p4 = scmp.lt.s32.totalorder %s642_s6, %s638_s26 }
 0x261   : > { %p640_p9 = pnand %p639_p5, %p923_p3 }
 0x262   : > { %p645_p6 = por %p644_p4, %p643_p1 }
 0x263   : > { %p641_p12 = pneg %p640_p9 }
 0x265   : > { %p646_p8 = pnand %p645_p6, %p641_p12 }
 0x267   : > { %649 = shalt.err (!%p646_p8)
}
 0x268   : > { %511 = dma.vmem_to_hbm [thread:$0]  (%p923_p3), %s392_s23, 128, %s389_s28, %s378_s11  }
 0x269 PF: > { %s403_s16 = sand.u32 1, %s680_s18   ;;  %p924_p11 = scmp.ne.s32.totalorder %s913_s25, 0 }
 0x26a   : > { %p925_p7 = scmp.ge.s32.totalorder %s692_s21, 2  ;;  %s404_s17 = scalar_lea.sflag [#allocation4], %s403_s16 }
 0x26c   : > { %p522_p10 = pnand %p925_p7, %p924_p11 }
 0x26e   : > { %p523_p2 = pneg %p522_p10 }
 0x270   : > { %675 = dma.done.wait (%p523_p2), %s404_s17, 128  }
 0x271   : > { %677 = vsyncadd (%p523_p2), %s404_s17, 4294967168  ;;  %p19_p13 = scmp.ge.s32.totalorder %s785_s30, 4   ;;  %s926_s18 = smov %s684_s19 }
 0x272   : > { %s927_s19 = smov %s688_s20  ;;  %s928_s20 = smov %s802_s13 }
 0x273   : > { %s929_s21 = smov %s785_s30  ;;  %21 = sbr.rel (!%p19_p13) target bundleno = 6 (0x6), region = 89 }
 0x278   :  { %409 = vsyncpa [#allocation3], 1 }
 0x279   :  { %411 = vsyncpa [#allocation3 + $0x1], 1 }
 0x27a   :  { %412 = vsyncpa [#allocation6], 1 }
 0x27b   :  { %413 = vsyncpa [#allocation4], 1 }
 0x27c   :  { %415 = vsyncpa [#allocation4 + $0x1], 1 }

</bundles_post_ra>
